<compile_context>
chip_gen: v7x
topology: tpu7x:2x2x1
jax: 0.10.0
libtpu: 0.0.40
codegen_flags: <defaults>
</compile_context>

<pallas_src>
import functools

import jax
import jax.numpy as jnp
from jax import lax
from jax.experimental import pallas as pl
from jax.experimental.pallas import tpu as pltpu


def mha_kernel(xq_ref, xk_ref, xv_ref, wq_ref, wk_ref, wv_ref, wfc_ref,
               out_ref, attn_ref, *, n_heads, d_k, d_v):
    f32 = jnp.float32
    bf16 = jnp.bfloat16

    # Per-batch tile: xq/xk/xv refs are (1, S, d_model); weights are full.
    xq = xq_ref[0].astype(bf16)          # (S, d_model)
    xk = xk_ref[0].astype(bf16)
    xv = xv_ref[0].astype(bf16)
    wq = wq_ref[...].astype(bf16)        # (d_model, n_heads * d_k)
    wk = wk_ref[...].astype(bf16)
    wv = wv_ref[...].astype(bf16)
    wfc = wfc_ref[...].astype(bf16)      # (n_heads * d_v, d_model)

    dn_row = (((1,), (0,)), ((), ()))    # contract last(lhs) with first(rhs)
    dn_tt = (((1,), (1,)), ((), ()))     # contract last(lhs) with last(rhs)

    # Wide projections (one matmul each, N = n_heads*d_k / n_heads*d_v).
    q_all = lax.dot_general(xq, wq, dn_row, preferred_element_type=f32)
    k_all = lax.dot_general(xk, wk, dn_row, preferred_element_type=f32)
    v_all = lax.dot_general(xv, wv, dn_row, preferred_element_type=f32)

    # Fold 1/sqrt(d_k) into Q (fewer elements than scaling the S x S scores).
    scale = jnp.float32(1.0 / (d_k ** 0.5))
    q_all = q_all * scale

    ctx_heads = []
    for h in range(n_heads):             # static unroll over (few) heads
        qh = q_all[:, h * d_k:(h + 1) * d_k]       # (S, d_k) f32
        kh = k_all[:, h * d_k:(h + 1) * d_k]
        vh = v_all[:, h * d_v:(h + 1) * d_v]

        # scores = qh @ kh^T without materializing a transpose.
        scores = lax.dot_general(qh.astype(bf16), kh.astype(bf16), dn_tt,
                                 preferred_element_type=f32)        # (S, S)

        m = jnp.max(scores, axis=-1, keepdims=True)
        e = jnp.exp(scores - m)
        inv = pl.reciprocal(jnp.sum(e, axis=-1, keepdims=True), approx=True)
        attn = e * inv                                              # (S, S)
        attn_ref[0, h, :, :] = attn

        ctx_heads.append(
            lax.dot_general(attn.astype(bf16), vh.astype(bf16), dn_row,
                            preferred_element_type=f32))            # (S, d_v)

    # Single wide fc matmul over the concatenated heads: (S, H*d_v) @ (H*d_v, d_model)
    ctx = jnp.concatenate(ctx_heads, axis=-1)
    out_ref[0] = lax.dot_general(ctx.astype(bf16), wfc, dn_row,
                                 preferred_element_type=f32)


def multi_head_attention(input_Q, input_K, input_V, wq_t, wk_t, wv_t, wfc_t,
                         *, n_heads, d_k, d_v):
    B, S, d_model = input_Q.shape
    kernel = functools.partial(mha_kernel, n_heads=n_heads, d_k=d_k, d_v=d_v)

    x_spec = pl.BlockSpec((1, S, d_model), lambda b: (b, 0, 0))
    w_spec = lambda shape: pl.BlockSpec(shape, lambda b: (0, 0))

    flops = (2 * B * S * d_model * n_heads * (2 * d_k + d_v)
             + 2 * B * n_heads * S * S * (d_k + d_v)
             + 2 * B * S * n_heads * d_v * d_model)
    transcendentals = B * n_heads * S * S
    bytes_accessed = 4 * (3 * B * S * d_model
                          + 2 * d_model * n_heads * d_k
                          + 2 * d_model * n_heads * d_v
                          + B * S * d_model
                          + B * n_heads * S * S)

    out, attn = pl.pallas_call(
        kernel,
        out_shape=(
            jax.ShapeDtypeStruct((B, S, d_model), jnp.float32),
            jax.ShapeDtypeStruct((B, n_heads, S, S), jnp.float32),
        ),
        grid=(B,),
        in_specs=[
            x_spec, x_spec, x_spec,
            w_spec(wq_t.shape), w_spec(wk_t.shape),
            w_spec(wv_t.shape), w_spec(wfc_t.shape),
        ],
        out_specs=(
            pl.BlockSpec((1, S, d_model), lambda b: (b, 0, 0)),
            pl.BlockSpec((1, n_heads, S, S), lambda b: (b, 0, 0, 0)),
        ),
        compiler_params=pltpu.CompilerParams(
            dimension_semantics=("parallel",)),
        cost_estimate=pl.CostEstimate(
            flops=flops, transcendentals=transcendentals,
            bytes_accessed=bytes_accessed),
    )(input_Q, input_K, input_V, wq_t, wk_t, wv_t, wfc_t)
    return out, attn


def reference_mha(xq, xk, xv, wq_t, wk_t, wv_t, wfc_t, *, n_heads, d_k, d_v):
    B, S, _ = xq.shape
    Q = (xq @ wq_t).reshape(B, S, n_heads, d_k).transpose(0, 2, 1, 3)
    K = (xk @ wk_t).reshape(B, S, n_heads, d_k).transpose(0, 2, 1, 3)
    V = (xv @ wv_t).reshape(B, S, n_heads, d_v).transpose(0, 2, 1, 3)
    scores = jnp.einsum("bhqd,bhkd->bhqk", Q, K) / jnp.sqrt(jnp.float32(d_k))
    attn = jax.nn.softmax(scores, axis=-1)
    ctx = jnp.einsum("bhqk,bhkd->bhqd", attn, V)
    ctx = ctx.transpose(0, 2, 1, 3).reshape(B, S, n_heads * d_v)
    out = ctx @ wfc_t
    return out, attn


if __name__ == "__main__":
    # Small shapes consistent with the module: batch=2, seq=8, d_model=32,
    # n_heads=2, d_k=d_v=16.
    B, S, d_model = 2, 8, 32
    n_heads, d_k, d_v = 2, 16, 16

    key = jax.random.PRNGKey(0)
    k1, k2, k3, k4, k5, k6, k7 = jax.random.split(key, 7)

    input_Q = jax.random.normal(k1, (B, S, d_model), jnp.float32)
    input_K = jax.random.normal(k2, (B, S, d_model), jnp.float32)
    input_V = jax.random.normal(k3, (B, S, d_model), jnp.float32)

    # nn.Linear weights are (out, in); store transposed (in, out) for x @ W.
    wq_t = (0.1 * jax.random.normal(k4, (d_k * n_heads, d_model), jnp.float32)).T
    wk_t = (0.1 * jax.random.normal(k5, (d_k * n_heads, d_model), jnp.float32)).T
    wv_t = (0.1 * jax.random.normal(k6, (d_v * n_heads, d_model), jnp.float32)).T
    wfc_t = (0.1 * jax.random.normal(k7, (d_model, n_heads * d_v), jnp.float32)).T

    out, attn = multi_head_attention(
        input_Q, input_K, input_V, wq_t, wk_t, wv_t, wfc_t,
        n_heads=n_heads, d_k=d_k, d_v=d_v)
    out = jax.block_until_ready(out)
    attn = jax.block_until_ready(attn)

    ref_out, ref_attn = reference_mha(
        input_Q, input_K, input_V, wq_t, wk_t, wv_t, wfc_t,
        n_heads=n_heads, d_k=d_k, d_v=d_v)

    # Tolerances loosened vs. the f32-only version: MXU operands are bf16
    # (f32 accumulation) and the softmax uses the EUP approximate reciprocal.
    assert jnp.allclose(out, ref_out, atol=3e-2, rtol=3e-2)
    assert jnp.allclose(attn, ref_attn, atol=2e-2, rtol=2e-2)
    print("KERNEL_OK")
</pallas_src>

<mosaic_0001>
module attributes {stable_mosaic.version = 11 : i64} {
  func.func @mha_kernel(%arg0: i32, %arg1: memref<1x8x32xf32, #tpu.memory_space<vmem>>, %arg2: memref<1x8x32xf32, #tpu.memory_space<vmem>>, %arg3: memref<1x8x32xf32, #tpu.memory_space<vmem>>, %arg4: memref<32x32xf32, #tpu.memory_space<vmem>>, %arg5: memref<32x32xf32, #tpu.memory_space<vmem>>, %arg6: memref<32x32xf32, #tpu.memory_space<vmem>>, %arg7: memref<32x32xf32, #tpu.memory_space<vmem>>, %arg8: memref<1x8x32xf32, #tpu.memory_space<vmem>>, %arg9: memref<1x2x8x8xf32, #tpu.memory_space<vmem>>) attributes {dimension_semantics = [#tpu.dimension_semantics<parallel>], iteration_bounds = array<i64: 2>, scalar_prefetch = 0 : i64, scratch_operands = 0 : i64, tpu.core_type = #tpu.core_type<tc>, window_params = [{transform_indices = @transform_0, window_bounds = array<i64: 1, 8, 32>}, {transform_indices = @transform_1, window_bounds = array<i64: 1, 8, 32>}, {transform_indices = @transform_2, window_bounds = array<i64: 1, 8, 32>}, {pipeline_mode = #tpu.pipeline_mode<synchronous>, transform_indices = @transform_3, window_bounds = array<i64: 32, 32>}, {pipeline_mode = #tpu.pipeline_mode<synchronous>, transform_indices = @transform_4, window_bounds = array<i64: 32, 32>}, {pipeline_mode = #tpu.pipeline_mode<synchronous>, transform_indices = @transform_5, window_bounds = array<i64: 32, 32>}, {pipeline_mode = #tpu.pipeline_mode<synchronous>, transform_indices = @transform_6, window_bounds = array<i64: 32, 32>}, {transform_indices = @transform_7, window_bounds = array<i64: 1, 8, 32>}, {transform_indices = @transform_8, window_bounds = array<i64: 1, 2, 8, 8>}]} {
    %c0 = arith.constant 0 : index
    %c0_0 = arith.constant 0 : index
    %c0_1 = arith.constant 0 : index
    %0 = vector.load %arg1[%c0, %c0_0, %c0_1] : memref<1x8x32xf32, #tpu.memory_space<vmem>>, vector<1x8x32xf32>
    %1 = vector.shape_cast %0 : vector<1x8x32xf32> to vector<8x32xf32>
    %2 = arith.truncf %1 : vector<8x32xf32> to vector<8x32xbf16>
    %c0_2 = arith.constant 0 : index
    %c0_3 = arith.constant 0 : index
    %c0_4 = arith.constant 0 : index
    %3 = vector.load %arg2[%c0_2, %c0_3, %c0_4] : memref<1x8x32xf32, #tpu.memory_space<vmem>>, vector<1x8x32xf32>
    %4 = vector.shape_cast %3 : vector<1x8x32xf32> to vector<8x32xf32>
    %5 = arith.truncf %4 : vector<8x32xf32> to vector<8x32xbf16>
    %c0_5 = arith.constant 0 : index
    %c0_6 = arith.constant 0 : index
    %c0_7 = arith.constant 0 : index
    %6 = vector.load %arg3[%c0_5, %c0_6, %c0_7] : memref<1x8x32xf32, #tpu.memory_space<vmem>>, vector<1x8x32xf32>
    %7 = vector.shape_cast %6 : vector<1x8x32xf32> to vector<8x32xf32>
    %8 = arith.truncf %7 : vector<8x32xf32> to vector<8x32xbf16>
    %c0_8 = arith.constant 0 : index
    %c0_9 = arith.constant 0 : index
    %9 = vector.load %arg4[%c0_8, %c0_9] : memref<32x32xf32, #tpu.memory_space<vmem>>, vector<32x32xf32>
    %10 = arith.truncf %9 : vector<32x32xf32> to vector<32x32xbf16>
    %c0_10 = arith.constant 0 : index
    %c0_11 = arith.constant 0 : index
    %11 = vector.load %arg5[%c0_10, %c0_11] : memref<32x32xf32, #tpu.memory_space<vmem>>, vector<32x32xf32>
    %12 = arith.truncf %11 : vector<32x32xf32> to vector<32x32xbf16>
    %c0_12 = arith.constant 0 : index
    %c0_13 = arith.constant 0 : index
    %13 = vector.load %arg6[%c0_12, %c0_13] : memref<32x32xf32, #tpu.memory_space<vmem>>, vector<32x32xf32>
    %14 = arith.truncf %13 : vector<32x32xf32> to vector<32x32xbf16>
    %c0_14 = arith.constant 0 : index
    %c0_15 = arith.constant 0 : index
    %15 = vector.load %arg7[%c0_14, %c0_15] : memref<32x32xf32, #tpu.memory_space<vmem>>, vector<32x32xf32>
    %16 = arith.truncf %15 : vector<32x32xf32> to vector<32x32xbf16>
    %cst = arith.constant dense<0.000000e+00> : vector<8x32xf32>
    %17 = tpu.matmul %2, %10, %cst {dimension_numbers = #tpu.dot_dimension_numbers<[1], [0], [0], [1], [0, 0, 1, 1], [], []>} : vector<8x32xbf16>, vector<32x32xbf16>, vector<8x32xf32> -> vector<8x32xf32>
    %cst_16 = arith.constant dense<0.000000e+00> : vector<8x32xf32>
    %18 = tpu.matmul %5, %12, %cst_16 {dimension_numbers = #tpu.dot_dimension_numbers<[1], [0], [0], [1], [0, 0, 1, 1], [], []>} : vector<8x32xbf16>, vector<32x32xbf16>, vector<8x32xf32> -> vector<8x32xf32>
    %cst_17 = arith.constant dense<0.000000e+00> : vector<8x32xf32>
    %19 = tpu.matmul %8, %14, %cst_17 {dimension_numbers = #tpu.dot_dimension_numbers<[1], [0], [0], [1], [0, 0, 1, 1], [], []>} : vector<8x32xbf16>, vector<32x32xbf16>, vector<8x32xf32> -> vector<8x32xf32>
    %cst_18 = arith.constant 2.500000e-01 : f32
    %20 = vector.broadcast %cst_18 : f32 to vector<8x32xf32>
    %21 = arith.mulf %17, %20 : vector<8x32xf32>
    %22 = vector.extract_strided_slice %21 {offsets = [0, 0], sizes = [8, 16], strides = [1, 1]} : vector<8x32xf32> to vector<8x16xf32>
    %23 = vector.extract_strided_slice %18 {offsets = [0, 0], sizes = [8, 16], strides = [1, 1]} : vector<8x32xf32> to vector<8x16xf32>
    %24 = vector.extract_strided_slice %19 {offsets = [0, 0], sizes = [8, 16], strides = [1, 1]} : vector<8x32xf32> to vector<8x16xf32>
    %25 = arith.truncf %22 : vector<8x16xf32> to vector<8x16xbf16>
    %26 = arith.truncf %23 : vector<8x16xf32> to vector<8x16xbf16>
    %cst_19 = arith.constant dense<0.000000e+00> : vector<8x8xf32>
    %27 = tpu.matmul %25, %26, %cst_19 {dimension_numbers = #tpu.dot_dimension_numbers<[1], [1], [0], [0], [0, 0, 1, 0], [], []>} : vector<8x16xbf16>, vector<8x16xbf16>, vector<8x8xf32> -> vector<8x8xf32>
    %cst_20 = arith.constant dense<0xFF800000> : vector<8xf32>
    %28 = vector.multi_reduction <maximumf>, %27, %cst_20 [1] : vector<8x8xf32> to vector<8xf32>
    %29 = vector.shape_cast %28 : vector<8xf32> to vector<8x1xf32>
    %30 = vector.broadcast %29 : vector<8x1xf32> to vector<8x8xf32>
    %31 = arith.subf %27, %30 : vector<8x8xf32>
    %32 = math.exp %31 : vector<8x8xf32>
    %cst_21 = arith.constant dense<0.000000e+00> : vector<8xf32>
    %33 = vector.multi_reduction <add>, %32, %cst_21 [1] : vector<8x8xf32> to vector<8xf32>
    %34 = vector.shape_cast %33 : vector<8xf32> to vector<8x1xf32>
    %35 = tpu.reciprocal %34 {approx = true} : vector<8x1xf32> -> vector<8x1xf32>
    %36 = vector.broadcast %35 : vector<8x1xf32> to vector<8x8xf32>
    %37 = arith.mulf %32, %36 : vector<8x8xf32>
    %c0_22 = arith.constant 0 : index
    %c0_23 = arith.constant 0 : index
    %c0_24 = arith.constant 0 : index
    %c0_25 = arith.constant 0 : index
    %38 = vector.load %arg9[%c0_22, %c0_23, %c0_24, %c0_25] : memref<1x2x8x8xf32, #tpu.memory_space<vmem>>, vector<1x1x8x8xf32>
    %39 = vector.shape_cast %38 : vector<1x1x8x8xf32> to vector<8x8xf32>
    %40 = vector.shape_cast %37 : vector<8x8xf32> to vector<1x1x8x8xf32>
    tpu.vector_store %arg9[%c0_22, %c0_23, %c0_24, %c0_25], %40 {strides = array<i32>} : memref<1x2x8x8xf32, #tpu.memory_space<vmem>>, vector<1x1x8x8xf32>,
    %41 = arith.truncf %37 : vector<8x8xf32> to vector<8x8xbf16>
    %42 = arith.truncf %24 : vector<8x16xf32> to vector<8x16xbf16>
    %cst_26 = arith.constant dense<0.000000e+00> : vector<8x16xf32>
    %43 = tpu.matmul %41, %42, %cst_26 {dimension_numbers = #tpu.dot_dimension_numbers<[1], [0], [0], [1], [0, 0, 1, 1], [], []>} : vector<8x8xbf16>, vector<8x16xbf16>, vector<8x16xf32> -> vector<8x16xf32>
    %44 = vector.extract_strided_slice %21 {offsets = [0, 16], sizes = [8, 16], strides = [1, 1]} : vector<8x32xf32> to vector<8x16xf32>
    %45 = vector.extract_strided_slice %18 {offsets = [0, 16], sizes = [8, 16], strides = [1, 1]} : vector<8x32xf32> to vector<8x16xf32>
    %46 = vector.extract_strided_slice %19 {offsets = [0, 16], sizes = [8, 16], strides = [1, 1]} : vector<8x32xf32> to vector<8x16xf32>
    %47 = arith.truncf %44 : vector<8x16xf32> to vector<8x16xbf16>
    %48 = arith.truncf %45 : vector<8x16xf32> to vector<8x16xbf16>
    %cst_27 = arith.constant dense<0.000000e+00> : vector<8x8xf32>
    %49 = tpu.matmul %47, %48, %cst_27 {dimension_numbers = #tpu.dot_dimension_numbers<[1], [1], [0], [0], [0, 0, 1, 0], [], []>} : vector<8x16xbf16>, vector<8x16xbf16>, vector<8x8xf32> -> vector<8x8xf32>
    %cst_28 = arith.constant dense<0xFF800000> : vector<8xf32>
    %50 = vector.multi_reduction <maximumf>, %49, %cst_28 [1] : vector<8x8xf32> to vector<8xf32>
    %51 = vector.shape_cast %50 : vector<8xf32> to vector<8x1xf32>
    %52 = vector.broadcast %51 : vector<8x1xf32> to vector<8x8xf32>
    %53 = arith.subf %49, %52 : vector<8x8xf32>
    %54 = math.exp %53 : vector<8x8xf32>
    %cst_29 = arith.constant dense<0.000000e+00> : vector<8xf32>
    %55 = vector.multi_reduction <add>, %54, %cst_29 [1] : vector<8x8xf32> to vector<8xf32>
    %56 = vector.shape_cast %55 : vector<8xf32> to vector<8x1xf32>
    %57 = tpu.reciprocal %56 {approx = true} : vector<8x1xf32> -> vector<8x1xf32>
    %58 = vector.broadcast %57 : vector<8x1xf32> to vector<8x8xf32>
    %59 = arith.mulf %54, %58 : vector<8x8xf32>
    %c0_30 = arith.constant 0 : index
    %c1 = arith.constant 1 : index
    %c0_31 = arith.constant 0 : index
    %c0_32 = arith.constant 0 : index
    %60 = vector.load %arg9[%c0_30, %c1, %c0_31, %c0_32] : memref<1x2x8x8xf32, #tpu.memory_space<vmem>>, vector<1x1x8x8xf32>
    %61 = vector.shape_cast %60 : vector<1x1x8x8xf32> to vector<8x8xf32>
    %62 = vector.shape_cast %59 : vector<8x8xf32> to vector<1x1x8x8xf32>
    tpu.vector_store %arg9[%c0_30, %c1, %c0_31, %c0_32], %62 {strides = array<i32>} : memref<1x2x8x8xf32, #tpu.memory_space<vmem>>, vector<1x1x8x8xf32>,
    %63 = arith.truncf %59 : vector<8x8xf32> to vector<8x8xbf16>
    %64 = arith.truncf %46 : vector<8x16xf32> to vector<8x16xbf16>
    %cst_33 = arith.constant dense<0.000000e+00> : vector<8x16xf32>
    %65 = tpu.matmul %63, %64, %cst_33 {dimension_numbers = #tpu.dot_dimension_numbers<[1], [0], [0], [1], [0, 0, 1, 1], [], []>} : vector<8x8xbf16>, vector<8x16xbf16>, vector<8x16xf32> -> vector<8x16xf32>
    %66 = tpu.concatenate %43, %65 in 1 : vector<8x16xf32>, vector<8x16xf32> -> vector<8x32xf32>
    %67 = arith.truncf %66 : vector<8x32xf32> to vector<8x32xbf16>
    %cst_34 = arith.constant dense<0.000000e+00> : vector<8x32xf32>
    %68 = tpu.matmul %67, %16, %cst_34 {dimension_numbers = #tpu.dot_dimension_numbers<[1], [0], [0], [1], [0, 0, 1, 1], [], []>} : vector<8x32xbf16>, vector<32x32xbf16>, vector<8x32xf32> -> vector<8x32xf32>
    %c0_35 = arith.constant 0 : index
    %c0_36 = arith.constant 0 : index
    %c0_37 = arith.constant 0 : index
    %69 = vector.load %arg8[%c0_35, %c0_36, %c0_37] : memref<1x8x32xf32, #tpu.memory_space<vmem>>, vector<1x8x32xf32>
    %70 = vector.shape_cast %69 : vector<1x8x32xf32> to vector<8x32xf32>
    %71 = vector.shape_cast %68 : vector<8x32xf32> to vector<1x8x32xf32>
    tpu.vector_store %arg8[%c0_35, %c0_36, %c0_37], %71 {strides = array<i32>} : memref<1x8x32xf32, #tpu.memory_space<vmem>>, vector<1x8x32xf32>,
    return
  }
  func.func @transform_0(%arg0: i32) -> (i32, i32, i32) {
    %c0_i32 = arith.constant 0 : i32
    %c0_i32_0 = arith.constant 0 : i32
    %c0_i32_1 = arith.constant 0 : i32
    return %arg0, %c0_i32, %c0_i32_0 : i32, i32, i32
  }
  func.func @transform_1(%arg0: i32) -> (i32, i32, i32) {
    %c0_i32 = arith.constant 0 : i32
    %c0_i32_0 = arith.constant 0 : i32
    %c0_i32_1 = arith.constant 0 : i32
    return %arg0, %c0_i32, %c0_i32_0 : i32, i32, i32
  }
  func.func @transform_2(%arg0: i32) -> (i32, i32, i32) {
    %c0_i32 = arith.constant 0 : i32
    %c0_i32_0 = arith.constant 0 : i32
    %c0_i32_1 = arith.constant 0 : i32
    return %arg0, %c0_i32, %c0_i32_0 : i32, i32, i32
  }
  func.func @transform_3(%arg0: i32) -> (i32, i32) {
    %c0_i32 = arith.constant 0 : i32
    %c0_i32_0 = arith.constant 0 : i32
    %c0_i32_1 = arith.constant 0 : i32
    return %c0_i32, %c0_i32_0 : i32, i32
  }
  func.func @transform_4(%arg0: i32) -> (i32, i32) {
    %c0_i32 = arith.constant 0 : i32
    %c0_i32_0 = arith.constant 0 : i32
    %c0_i32_1 = arith.constant 0 : i32
    return %c0_i32, %c0_i32_0 : i32, i32
  }
  func.func @transform_5(%arg0: i32) -> (i32, i32) {
    %c0_i32 = arith.constant 0 : i32
    %c0_i32_0 = arith.constant 0 : i32
    %c0_i32_1 = arith.constant 0 : i32
    return %c0_i32, %c0_i32_0 : i32, i32
  }
  func.func @transform_6(%arg0: i32) -> (i32, i32) {
    %c0_i32 = arith.constant 0 : i32
    %c0_i32_0 = arith.constant 0 : i32
    %c0_i32_1 = arith.constant 0 : i32
    return %c0_i32, %c0_i32_0 : i32, i32
  }
  func.func @transform_7(%arg0: i32) -> (i32, i32, i32) {
    %c0_i32 = arith.constant 0 : i32
    %c0_i32_0 = arith.constant 0 : i32
    %c0_i32_1 = arith.constant 0 : i32
    return %arg0, %c0_i32, %c0_i32_0 : i32, i32, i32
  }
  func.func @transform_8(%arg0: i32) -> (i32, i32, i32, i32) {
    %c0_i32 = arith.constant 0 : i32
    %c0_i32_0 = arith.constant 0 : i32
    %c0_i32_1 = arith.constant 0 : i32
    %c0_i32_2 = arith.constant 0 : i32
    return %arg0, %c0_i32, %c0_i32_0, %c0_i32_1 : i32, i32, i32, i32
  }
}

</mosaic_0001>

<bundles_post_ra>
// kernel: tpu_custom_call.1
= control target key start
LH: loop header
LB: loop body
LE: loop exit
PB: predicated region body
PF: predicated region fallthrough
CT: control target
= control target key end

     0   :  { %s2178_s0 = inlined_call_operand.hbm [shape: f32[2,8,32], index: 0, kind: input, shape index: {}]   ;;  %s2179_s1 = inlined_call_operand.hbm [shape: f32[2,8,32], index: 1, kind: input, shape index: {}]   ;;  %s2180_s2 = inlined_call_operand.hbm [shape: f32[2,8,32], index: 2, kind: input, shape index: {}]   ;;  %s2181_s3 = inlined_call_operand.hbm [shape: f32[32,32], index: 3, kind: input, shape index: {}]   ;;  %s2182_s4 = inlined_call_operand.hbm [shape: f32[32,32], index: 4, kind: input, shape index: {}]   ;;  %s2183_s5 = inlined_call_operand.hbm [shape: f32[32,32], index: 5, kind: input, shape index: {}]   ;;  %s2184_s6 = inlined_call_operand.hbm [shape: f32[32,32], index: 6, kind: input, shape index: {}]   ;;  %s2185_s7 = inlined_call_operand.hbm [shape: f32[2,8,32], index: 7, kind: output, shape index: {0}]   ;;  %s2186_s8 = inlined_call_operand.hbm [shape: f32[2,2,8,8], index: 8, kind: output, shape index: {1}]  }
   0x1   :  { %2211 = sst [smem:[#allocation28_spill]] %s2179_s1 }
   0x2   :  { %2212 = sst [smem:[#allocation29_spill]] %s2181_s3 }
   0x3   :  { %2213 = sst [smem:[#allocation30_spill]] %s2183_s5 }
   0x4   :  { %2214 = sst [smem:[#allocation31_spill]] %s2185_s7 }
   0x5   :  { %2215 = sst [smem:[#allocation32_spill]] %s2186_s8 }
   0x6   :  { %14 = vsyncpa [#allocation3], 0 }
   0x7   :  { %16 = vsyncpa [#allocation3 + $0x1], 0 }
   0x8   :  { %17 = vsyncpa [#allocation6], 0 }
   0x9   :  { %19 = vsyncpa [#allocation6 + $0x1], 0 }
   0xa   :  { %20 = vsyncpa [#allocation9], 0 }
   0xb   :  { %21 = vsyncpa [#allocation12], 0 }
   0xc   :  { %22 = vsyncpa [#allocation4], 0 }
   0xd   :  { %24 = vsyncpa [#allocation4 + $0x1], 0 }
   0xe   :  { %25 = vsyncpa [#allocation16], 0 }
   0xf   :  { %27 = vsyncpa [#allocation16 + $0x1], 0  ;;  %s1727_s27 = smov 0   ;;  %s1729_s28 = smov 0  }
  0x10   :  { %s1731_s29 = smov 0   ;;  %s1733_s30 = smov 0  }
  0x11 LB: > { %2216 = sst [smem:[#allocation23_spill]] %s1651_s27  ;;  %s1665_s9 = smov [#allocation8]   ;;  %s1663_s30 = sphi %s1733_s30, %s2254_s30   ;;  %s1659_s29 = sphi %s1731_s29, %s2258_s29   ;;  %s1655_s28 = sphi %s1729_s28, %s2257_s28   ;;  %s1651_s27 = sphi %s1727_s27, %s2256_s27  }
  0x12   : > { %2217 = sst [smem:[#allocation24_spill]] %s1663_s30  ;;  %s264_s10 = sshll.u32 %s1665_s9, 4  ;;  %s1753_s10 = int_to_ptr.vmem [resolvable:$true] %s264_s10 }
  0x13   : > { %s1748_s11 = sadd.s32 4294967295, %s1663_s30   ;;  %p1118_p0 = scmp.ge.s32.totalorder %s1663_s30, 1 }
  0x14   : > { %p2197_p1 = scmp.eq.s32.totalorder %s1748_s11, 0  ;;  %p252_p2 = scmp.lt.s32.totalorder %s1663_s30, 3 }
  0x15   : > { %s1666_s13 = smov [#allocation11]   ;;  %s2220_s3 = sld [smem:[#allocation29_spill]] }
  0x16   : > { %p1755_p3 = pnand %p1118_p0, %p252_p2  ;;  %s290_s14 = sshll.u32 %s1666_s13, 4  ;;  %s1768_s14 = int_to_ptr.vmem [resolvable:$true] %s290_s14 }
  0x18   : > { %s2218_s12 = scalar_select %p1755_p3, 1, 0 }
  0x19   : > { %p1259_p5 = pneg %p1755_p3 }
  0x1b   : > { %p1764_p6 = pnand %p1259_p5, %p2197_p1  ;;  %s1351_s18 = scalar_lea.hbm %s2220_s3, 512 }
  0x1c   : > { %p1352_p7 = scmp.ne.s32.totalorder %s2220_s3, %s1351_s18  ;;  %p1358_p11 = scmp.lt.u32.totalorder %s1351_s18, %s2220_s3 }
  0x1d   : > { %s2219_s15 = scalar_select %p1764_p6, 1, 0 }
  0x1e   : > { %p1778_p8 = pneg %p1764_p6 }
  0x20   : > { %s2221_s21 = scalar_select %p1778_p8, 1, 0 }
  0x21   : > { %p1354_p9 = pnand %p1778_p8, %p1352_p7 }
  0x23   : > { %p1355_p10 = pneg %p1354_p9 }
  0x25   : > { %p1360_p12 = pnand %p1358_p11, %p1355_p10 }
  0x27   : > { %1363 = shalt.err (!%p1360_p12)
}
  0x28   : > { %s1364_s24 = scalar_lea.vmem %s1753_s10, 512  ;;  %p1372_p5 = scmp.lt.s32.totalorder %s1753_s10, %s1753_s10 }
  0x29   : > { %p1365_p13 = scmp.ne.s32.totalorder %s1753_s10, %s1364_s24  ;;  %p1373_p4 = scmp.lt.s32.totalorder %s1364_s24, %s1364_s24 }
  0x2b   : > { %p1367_p0 = pnand %p1365_p13, %p1778_p8  ;;  %p1374_p7 = por %p1373_p4, %p1372_p5 }
  0x2d   : > { %p1368_p2 = pneg %p1367_p0 }
  0x2f   : > { %p1375_p9 = pnand %p1374_p7, %p1368_p2 }
  0x31   : > { %1378 = shalt.err (!%p1375_p9)
}
  0x32   : > { %s2188_s25 = smov 128   ;;  %s2191_s26 = smov 8  }
  0x33   : > { %1262 = dma.hbm_to_vmem [thread:$0]  (!%p1764_p6), %s2220_s3, 512, %s1753_s10, [#allocation9], %s2188_s25, %s2188_s25, %s2191_s26  }
  0x34   : > { %s2222_s5 = sld [smem:[#allocation30_spill]] }
  0x3a   : > { %s1379_s18 = scalar_lea.hbm %s2222_s5, 512 }
  0x3b   : > { %p1380_p4 = scmp.ne.s32.totalorder %s2222_s5, %s1379_s18  ;;  %p1386_p12 = scmp.lt.u32.totalorder %s1379_s18, %s2222_s5 }
  0x3d   : > { %p1382_p10 = pnand %p1380_p4, %p1778_p8 }
  0x3f   : > { %p1383_p11 = pneg %p1382_p10 }
  0x41   : > { %p1388_p13 = pnand %p1386_p12, %p1383_p11 }
  0x43   : > { %1391 = shalt.err (!%p1388_p13)
}
  0x44   : > { %s1392_s10 = scalar_lea.vmem %s1768_s14, 512  ;;  %p1400_p7 = scmp.lt.s32.totalorder %s1768_s14, %s1768_s14 }
  0x45   : > { %p1393_p0 = scmp.ne.s32.totalorder %s1768_s14, %s1392_s10  ;;  %p1401_p9 = scmp.lt.s32.totalorder %s1392_s10, %s1392_s10 }
  0x47   : > { %p1395_p2 = pnand %p1393_p0, %p1778_p8  ;;  %p1402_p4 = por %p1401_p9, %p1400_p7 }
  0x49   : > { %p1396_p5 = pneg %p1395_p2 }
  0x4b   : > { %p1403_p10 = pnand %p1402_p4, %p1396_p5 }
  0x4d   : > { %1406 = shalt.err (!%p1403_p10)
}
  0x4e   : > { %1268 = dma.hbm_to_vmem [thread:$0]  (!%p1764_p6), %s2222_s5, 512, %s1768_s14, [#allocation12], %s2188_s25, %s2188_s25, %s2191_s26  }
  0x4f   : > { %s1117_s13 = sadd.s32 4294967294, %s1663_s30   ;;  %s1830_s16 = sadd.s32 1, %s1663_s30  }
  0x50   : > { %2223 = sst [smem:[#allocation25_spill]] %s1830_s16  ;;  %s37_s17 = ssub.s32 %s1663_s30, %s1830_s16 }
  0x51   : > { %s40_s18 = sadd.s32 1, %s1659_s29  ;;  %p38_p11 = scmp.eq.s32.totalorder %s37_s17, 0 }
  0x52   : > { %p47_p12 = scmp.ne.s32.totalorder %s1659_s29, %s1655_s28  ;;  %p48_p13 = scmp.eq.s32.totalorder %s1663_s30, 0 }
  0x53   : > { %p53_p0 = scmp.ne.s32.totalorder %s1655_s28, %s1651_s27  ;;  %p213_p7 = scmp.eq.s32.totalorder %s1748_s11, 1 }
  0x54   : > { %s1841_s19 = scalar_select %p38_p11, %s1659_s29, %s40_s18  }
  0x55   : > { %p49_p2 = por %p48_p13, %p47_p12  ;;  %p1845_p5 = por %p2197_p1, %p53_p0 }
  0x56   : > { %2224 = sst [smem:[#allocation26_spill]] %s1841_s19  ;;  %p219_p9 = scmp.eq.s32.totalorder %s1117_s13, 1 }
  0x57   : > { %s2225_s20 = scalar_select %p1845_p5, 1, 0 }
  0x58   : > { %p1293_p4 = scmp.lt.s32.totalorder %s1663_s30, 2  ;;  %s2190_s14 = sand.u32 1, %s1659_s29  }
  0x59   : > { %p1852_p10 = por %p213_p7, %p47_p12  ;;  %p1856_p3 = por %p219_p9, %p53_p0 }
  0x5a   : > { %s1862_s10 = sshll.u32 %s2190_s14, 3  ;;  %s1865_s24 = sshll.u32 %s1663_s30, 7 }
  0x5b   : > { %s2226_s22 = scalar_select %p1852_p10, 1, 0 }
  0x5c   : > { %s2227_s23 = scalar_select %p1856_p3, 1, 0 }
  0x5d   : > { %p1867_p11 = pnand %p1293_p4, %p49_p2  ;;  %s335_s13 = sand.u32 1, %s1663_s30  }
  0x5e   : > { %2228 = sst [smem:[#allocation27_spill]] %s2227_s23  ;;  %s2230_s1 = sld [smem:[#allocation28_spill]] }
  0x5f   : > { %s2229_s9 = scalar_select %p1867_p11, 1, 0 }
  0x60   : > { %s339_s14 = scalar_lea.vmem [#allocation5], %s1862_s10  ;;  %s1669_s3 = smov [#allocation10]  }
  0x61   : > { %s346_s26 = sshll.u32 %s339_s14, 4  ;;  %s1881_s5 = sshll.u32 %s1669_s3, 4  ;;  %s1879_s26 = int_to_ptr.vmem [resolvable:$true] %s346_s26  ;;  %s278_s5 = int_to_ptr.vmem [resolvable:$true] %s1881_s5 }
  0x62   : > { %s1883_s19 = scalar_lea.sflag [#allocation6], %s335_s13  ;;  %p1889_p13 = pneg %p1867_p11 }
  0x64   : > { %s1876_s25 = scalar_lea.hbm %s2230_s1, %s1865_s24  ;;  %s1412_s30 = scalar_lea.hbm %s2230_s1, 256 }
  0x65   : > { %s1407_s16 = scalar_lea.hbm %s1876_s25, 128  ;;  %p1413_p7 = scmp.lt.u32.totalorder %s1876_s25, %s2230_s1 }
  0x66   : > { %p1408_p12 = scmp.ne.s32.totalorder %s1876_s25, %s1407_s16  ;;  %p1414_p9 = scmp.lt.u32.totalorder %s1412_s30, %s1407_s16 }
  0x67   : > { %s2231_s17 = scalar_select %p1889_p13, 1, 0 }
  0x68   : > { %p1410_p0 = pnand %p1889_p13, %p1408_p12  ;;  %p1415_p4 = por %p1414_p9, %p1413_p7 }
  0x69   : > { %p1416_p1 = scmp.lt.u32.totalorder %s1407_s16, %s1876_s25 }
  0x6a   : > { %p1411_p2 = pneg %p1410_p0 }
  0x6b   : > { %p1417_p3 = por %p1416_p1, %p1415_p4 }
  0x6d   : > { %p1418_p10 = pnand %p1417_p3, %p1411_p2 }
  0x6f   : > { %1421 = shalt.err (!%p1418_p10)
}
  0x70   : > { %s1422_s13 = scalar_lea.vmem %s1879_s26, 128  ;;  %s1670_s18 = smov [#allocation5]  }
  0x71   : > { %p1423_p12 = scmp.ne.s32.totalorder %s1879_s26, %s1422_s13  ;;  %s1427_s14 = sshll.u32 %s1670_s18, 4  ;;  %s1428_s14 = int_to_ptr.vmem [resolvable:$false] %s1427_s14 }
  0x72   : > { %s1429_s23 = scalar_lea.vmem %s1428_s14, 256  ;;  %p1430_p6 = scmp.lt.s32.totalorder %s1879_s26, %s1428_s14 }
  0x73   : > { %p1425_p0 = pnand %p1423_p12, %p1889_p13  ;;  %p1431_p8 = scmp.lt.s32.totalorder %s1429_s23, %s1422_s13 }
  0x75   : > { %p1426_p5 = pneg %p1425_p0  ;;  %p1432_p7 = por %p1431_p8, %p1430_p6 }
  0x77   : > { %p1433_p9 = pnand %p1432_p7, %p1426_p5 }
  0x79   : > { %1436 = shalt.err (!%p1433_p9)
}
  0x7a   : > { %1278 = dma.hbm_to_vmem [thread:$0]  (!%p1867_p11), %s1876_s25, 128, %s1879_s26, %s1883_s19  }
  0x7b   : > { %s1437_s3 = scalar_lea.hbm %s2182_s4, 512  ;;  %p2232_p3 = scmp.ne.s32.totalorder %s2221_s21, 0 }
  0x7c   : > { %p1438_p1 = scmp.ne.s32.totalorder %s2182_s4, %s1437_s3  ;;  %p1444_p5 = scmp.lt.u32.totalorder %s1437_s3, %s2182_s4 }
  0x7e   : > { %p1440_p6 = pnand %p1438_p1, %p2232_p3 }
  0x80   : > { %p1441_p8 = pneg %p1440_p6 }
  0x82   : > { %p1446_p10 = pnand %p1444_p5, %p1441_p8 }
  0x84   : > { %1449 = shalt.err (!%p1446_p10)
}
  0x85   : > { %s1450_s23 = scalar_lea.vmem %s278_s5, 512  ;;  %p1458_p0 = scmp.lt.s32.totalorder %s278_s5, %s278_s5 }
  0x86   : > { %p1451_p2 = scmp.ne.s32.totalorder %s278_s5, %s1450_s23  ;;  %p1459_p7 = scmp.lt.s32.totalorder %s1450_s23, %s1450_s23 }
  0x88   : > { %p1453_p4 = pnand %p1451_p2, %p2232_p3  ;;  %p1460_p9 = por %p1459_p7, %p1458_p0 }
  0x8a   : > { %p1454_p12 = pneg %p1453_p4 }
  0x8c   : > { %p1461_p11 = pnand %p1460_p9, %p1454_p12 }
  0x8e   : > { %1464 = shalt.err (!%p1461_p11)
}
  0x8f   : > { %p2233_p1 = scmp.ne.s32.totalorder %s2219_s15, 0  ;;  %s2234_s1 = smov 8  }
  0x90   : > { %s2235_s25 = smov 128   ;;  %s1671_s16 = smov [#allocation13]  }
  0x91   : > { %1265 = dma.hbm_to_vmem [thread:$0]  (!%p2233_p1), %s2182_s4, 512, %s278_s5, [#allocation9], %s2235_s25, %s2235_s25, %s2234_s1  }
  0x92   : > { %s303_s3 = sshll.u32 %s1671_s16, 4  ;;  %s1465_s14 = scalar_lea.hbm %s2184_s6, 512  ;;  %s304_s3 = int_to_ptr.vmem [resolvable:$true] %s303_s3 }
  0x93   : > { %p1466_p11 = scmp.ne.s32.totalorder %s2184_s6, %s1465_s14  ;;  %p1472_p5 = scmp.lt.u32.totalorder %s1465_s14, %s2184_s6 }
  0x95   : > { %p1468_p6 = pnand %p1466_p11, %p2232_p3 }
  0x97   : > { %p1469_p8 = pneg %p1468_p6 }
  0x99   : > { %p1474_p10 = pnand %p1472_p5, %p1469_p8 }
  0x9b   : > { %1477 = shalt.err (!%p1474_p10)
}
  0x9c   : > { %s1478_s5 = scalar_lea.vmem %s304_s3, 512  ;;  %p1486_p0 = scmp.lt.s32.totalorder %s304_s3, %s304_s3 }
  0x9d   : > { %p1479_p2 = scmp.ne.s32.totalorder %s304_s3, %s1478_s5  ;;  %p1487_p7 = scmp.lt.s32.totalorder %s1478_s5, %s1478_s5 }
  0x9f   : > { %p1481_p4 = pnand %p1479_p2, %p2232_p3  ;;  %p1488_p9 = por %p1487_p7, %p1486_p0 }
  0xa1   : > { %p1482_p12 = pneg %p1481_p4 }
  0xa3   : > { %p1489_p13 = pnand %p1488_p9, %p1482_p12 }
  0xa5   : > { %1492 = shalt.err (!%p1489_p13)
}
  0xa6   : > { %1271 = dma.hbm_to_vmem [thread:$0]  (!%p2233_p1), %s2184_s6, 512, %s304_s3, [#allocation12], %s2235_s25, %s2235_s25, %s2234_s1  }
  0xa7   : > { %s1960_s26 = scalar_lea.hbm %s2178_s0, %s1865_s24  ;;  %s321_s15 = scalar_lea.vmem [#allocation2], %s1862_s10 }
  0xa8   : > { %s328_s30 = sshll.u32 %s321_s15, 4  ;;  %s2236_s16 = sand.u32 1, %s1659_s29   ;;  %s329_s30 = int_to_ptr.vmem [resolvable:$true] %s328_s30 }
  0xa9   : > { %s318_s18 = scalar_lea.sflag [#allocation3], %s2236_s16  ;;  %s1493_s13 = scalar_lea.hbm %s1960_s26, 128 }
  0xaa   : > { %p1494_p13 = scmp.ne.s32.totalorder %s1960_s26, %s1493_s13  ;;  %p2237_p3 = scmp.ne.s32.totalorder %s2231_s17, 0 }
  0xab   : > { %s1498_s3 = scalar_lea.hbm %s2178_s0, 256  ;;  %p1499_p1 = scmp.lt.u32.totalorder %s1960_s26, %s2178_s0 }
  0xac   : > { %p1496_p11 = pnand %p1494_p13, %p2237_p3  ;;  %p1500_p8 = scmp.lt.u32.totalorder %s1498_s3, %s1493_s13 }
  0xad   : > { %p1502_p10 = scmp.lt.u32.totalorder %s1493_s13, %s1960_s26 }
  0xae   : > { %p1497_p6 = pneg %p1496_p11  ;;  %p1501_p5 = por %p1500_p8, %p1499_p1 }
  0xb0   : > { %p1503_p2 = por %p1502_p10, %p1501_p5 }
  0xb2   : > { %p1504_p4 = pnand %p1503_p2, %p1497_p6 }
  0xb4   : > { %1507 = shalt.err (!%p1504_p4)
}
  0xb5   : > { %s1508_s5 = scalar_lea.vmem %s329_s30, 128  ;;  %s1672_s7 = smov [#allocation2]  }
  0xb6   : > { %p1509_p12 = scmp.ne.s32.totalorder %s329_s30, %s1508_s5  ;;  %s1513_s8 = sshll.u32 %s1672_s7, 4  ;;  %s1514_s8 = int_to_ptr.vmem [resolvable:$false] %s1513_s8 }
  0xb7   : > { %s1515_s27 = scalar_lea.vmem %s1514_s8, 256  ;;  %p1516_p9 = scmp.lt.s32.totalorder %s329_s30, %s1514_s8 }
  0xb8   : > { %p1511_p0 = pnand %p1509_p12, %p2237_p3  ;;  %p1517_p13 = scmp.lt.s32.totalorder %s1515_s27, %s1508_s5 }
  0xba   : > { %p1512_p7 = pneg %p1511_p0  ;;  %p1518_p11 = por %p1517_p13, %p1516_p9 }
  0xbc   : > { %p1519_p1 = pnand %p1518_p11, %p1512_p7 }
  0xbe   : > { %1522 = shalt.err (!%p1519_p1)
}
  0xbf   : > { %p2238_p8 = scmp.ne.s32.totalorder %s2229_s9, 0  ;;  %s1986_s16 = scalar_lea.hbm %s2180_s2, %s1865_s24 }
  0xc0   : > { %s357_s13 = scalar_lea.vmem [#allocation7], %s1862_s10  ;;  %s1523_s25 = scalar_lea.hbm %s1986_s16, 128 }
  0xc1   : > { %1275 = dma.hbm_to_vmem [thread:$0]  (!%p2238_p8), %s1960_s26, 128, %s329_s30, %s318_s18  }
  0xc2   : > { %s364_s1 = sshll.u32 %s357_s13, 4  ;;  %p1524_p6 = scmp.ne.s32.totalorder %s1986_s16, %s1523_s25  ;;  %s365_s1 = int_to_ptr.vmem [resolvable:$true] %s364_s1 }
  0xc3   : > { %s1528_s26 = scalar_lea.hbm %s2180_s2, 256  ;;  %p1529_p2 = scmp.lt.u32.totalorder %s1986_s16, %s2180_s2 }
  0xc4   : > { %p1526_p5 = pnand %p1524_p6, %p2237_p3  ;;  %p1530_p4 = scmp.lt.u32.totalorder %s1528_s26, %s1523_s25 }
  0xc5   : > { %p1532_p0 = scmp.lt.u32.totalorder %s1523_s25, %s1986_s16 }
  0xc6   : > { %p1527_p10 = pneg %p1526_p5  ;;  %p1531_p12 = por %p1530_p4, %p1529_p2 }
  0xc8   : > { %p1533_p7 = por %p1532_p0, %p1531_p12 }
  0xca   : > { %p1534_p9 = pnand %p1533_p7, %p1527_p10 }
  0xcc   : > { %1537 = shalt.err (!%p1534_p9)
}
  0xcd   : > { %s1538_s10 = scalar_lea.vmem %s365_s1, 128  ;;  %s1673_s24 = smov [#allocation7]  }
  0xce   : > { %p1539_p13 = scmp.ne.s32.totalorder %s365_s1, %s1538_s10  ;;  %s1543_s23 = sshll.u32 %s1673_s24, 4  ;;  %s1544_s23 = int_to_ptr.vmem [resolvable:$false] %s1543_s23 }
  0xcf   : > { %s1545_s5 = scalar_lea.vmem %s1544_s23, 256  ;;  %p1546_p6 = scmp.lt.s32.totalorder %s365_s1, %s1544_s23 }
  0xd0   : > { %p1541_p11 = pnand %p1539_p13, %p2237_p3  ;;  %p1547_p5 = scmp.lt.s32.totalorder %s1545_s5, %s1538_s10 }
  0xd2   : > { %p1542_p1 = pneg %p1541_p11  ;;  %p1548_p8 = por %p1547_p5, %p1546_p6 }
  0xd4   : > { %p1549_p2 = pnand %p1548_p8, %p1542_p1 }
  0xd6   : > { %1552 = shalt.err (!%p1549_p2)
}
  0xd7   : > { %p2239_p4 = scmp.ne.s32.totalorder %s2229_s9, 0  ;;  %p2240_p10 = scmp.ne.s32.totalorder %s2218_s12, 0 }
  0xd8   : > { %s2010_s17 = sand.u32 (!%p2240_p10), 1, %s1655_s28   ;;  %p2241_p3 = scmp.ne.s32.totalorder (!%p2240_p10), %s2225_s20, 0 }
  0xd9   : > { %1281 = dma.hbm_to_vmem [thread:$0]  (!%p2239_p4), %s1986_s16, 128, %s365_s1, %s1883_s19  }
  0xda   : > { %373 = sbr.rel (%p2240_p10) target bundleno = 1667 (0x683), region = 48  ;;  %s2013_s7 = sshll.u32 (!%p2240_p10), %s2010_s17, 3 }
  0xdb   : > { %s376_s8 = scalar_lea.sflag (!%p2240_p10), [#allocation3], %s2010_s17  ;;  %s379_s27 = scalar_lea.vmem (!%p2240_p10), [#allocation2], %s2013_s7 }
  0xe1   : > { %1626 = dma.done.wait (%p2241_p3), %s376_s8, 128  }
  0xe2   : > { %1628 = vsyncadd (%p2241_p3), %s376_s8, 4294967168  ;;  %s384_s12 = sand.u32 1, %s1748_s11   ;;  %s388_s9 = scalar_lea.vmem [#allocation5], %s2013_s7 }
  0xe3   : > { %s385_s19 = scalar_lea.sflag [#allocation6], %s384_s12 }
  0xe4   : > { %1630 = dma.done.wait (%p2241_p3), %s385_s19, 256  }
  0xe5   : > { %1632 = vsyncadd (%p2241_p3), %s385_s19, 4294967040  ;;  %s397_s21 = scalar_lea.vmem [#allocation7], %s2013_s7  ;;  %p2242_p8 = scmp.eq.s32.totalorder %s1748_s11, 0 }
  0xe7   : > { %1634 = dma.done.wait (%p2242_p8), [#allocation9], 1024   ;;  %p2243_p12 = pmov %p2242_p8 }
  0xe8   : > { %p2244_p0 = pmov %p2242_p8 }
  0xe9   : > { %1636 = vsyncadd (%p2243_p12), [#allocation9], 4294966272 }
  0xea   : > { %1638 = dma.done.wait (%p2244_p0), [#allocation12], 1024   ;;  %p2245_p7 = pmov %p2244_p0 }
  0xeb   : > { %v1674_v0 = vmov 0.0   ;;  %vm1675_vm0 = vmmov 0   ;;  %v474_v1 = vld [vmem:[#allocation10] sm:$0xff]  ;;  %v475_v2 = vld [vmem:[#allocation10 + $0x8] sm:$0xff]  ;;  %v476_v6 = vld [vmem:[#allocation10 + $0x10] sm:$0xff]  ;;  %vm492_vm1 = vcmask 261120  }
  0xec   : > { %1640 = vsyncadd (%p2245_p7), [#allocation12], 4294966272  ;;  %1185 = vmatprep.subr.bf16.mxu1 %v1674_v0  ;;  %1177 = vmatprep.subr.bf16.mxu0 %v1674_v0  ;;  %v468_v3 = vld [vmem:[#allocation8] sm:$0xff]  ;;  %v478_v4 = vpack.c.bf16 %v475_v2, %v474_v1  ;;  %v469_v5 = vld [vmem:[#allocation8 + $0x8] sm:$0xff]  ;;  %vm625_vm2 = vcmask 130048   ;;  %s1676_s20 = smov 112  }
  0xed   : > { %1189 = vmatprep.mubr.msk.bf16.mxu1 %vm1675_vm0, %v1674_v0  ;;  %1181 = vmatprep.mubr.msk.bf16.mxu0 %vm1675_vm0, %v1674_v0  ;;  %v477_v7 = vld [vmem:[#allocation10 + $0x18] sm:$0xff]  ;;  %v472_v8 = vpack.c.bf16 %v469_v5, %v468_v3  ;;  %v470_v9 = vld [vmem:[#allocation8 + $0x10] sm:$0xff]  ;;  %v464_v12 = vld [vmem:[%s388_s9] sm:$0xff]  ;;  %vm672_vm3 = vcmask 64512   ;;  %vm690_vm4 = vcmask 1043456   ;;  %s1139_s15 = sshll.u32 %s2010_s17, 4 }
  0xee   : > { %v471_v10 = vld [vmem:[#allocation8 + $0x18] sm:$0xff]  ;;  %1186 = vmatpush3.bf16.msra.mxu1 %v478_v4  ;;  %v479_v11 = vpack.c.bf16 %v477_v7, %v476_v6  ;;  %v465_v15 = vpack.c.bf16 %v464_v12, %v464_v12  ;;  %v480_v29 = vld [vmem:[#allocation11] sm:$0xff]  ;;  %v481_v30 = vld [vmem:[#allocation11 + $0x8] sm:$0xff]  ;;  %s2081_s16 = scalar_lea.vmem [#allocation15], %s1139_s15  ;;  %s1677_s13 = smov 16  }
  0xef   : > { %1187 = vmatprep.subr.bf16.mxu1 %v1674_v0  ;;  %1178 = vmatpush3.bf16.msra.mxu0 %v472_v8  ;;  %v473_v13 = vpack.c.bf16 %v471_v10, %v470_v9  ;;  %v462_v14 = vld [vmem:[%s379_s27] sm:$0xff]  ;;  %v484_v32 = vpack.c.bf16 %v481_v30, %v480_v29  ;;  %s1156_s1 = sshll.u32 %s1748_s11, 8  ;;  %s931_s25 = sshll.u32 %s2081_s16, 4  ;;  %s2102_s25 = int_to_ptr.vmem [resolvable:$true] %s931_s25 }
  0xf0   : > { %1179 = vmatprep.subr.bf16.mxu0 %v1674_v0  ;;  %v463_v16 = vpack.c.bf16 %v462_v14, %v462_v14  ;;  %v482_v31 = vld [vmem:[#allocation11 + $0x10] sm:$0xff]  ;;  %v483_v33 = vld [vmem:[#allocation11 + $0x18] sm:$0xff]  ;;  %v487_v14 = vld [vmem:[#allocation13 + $0x8] sm:$0xff]  ;;  %s2246_s26 = sld [smem:[#allocation32_spill]]  ;;  %s905_s18 = scalar_lea.sflag [#allocation16], %s2010_s17 }
  0xf1   : > { %v485_v34 = vpack.c.bf16 %v483_v33, %v482_v31  ;;  %v466_v35 = vld [vmem:[%s397_s21] sm:$0xff]  ;;  %s1553_s10 = scalar_lea.vmem %s2102_s25, 256  ;;  %p2247_p13 = scmp.ne.s32.totalorder %s2226_s22, 0 }
  0xf2   : > { %1188 = vmatpush3.bf16.msra.mxu1 %v479_v11  ;;  %v467_v36 = vpack.c.bf16 %v466_v35, %v466_v35  ;;  %p1554_p9 = scmp.ne.s32.totalorder %s2102_s25, %s1553_s10  ;;  %s1678_s24 = smov [#allocation15]  }
  0xf3   : > { %1180 = vmatpush3.bf16.msra.mxu0 %v473_v13  ;;  %1201 = vmatprep.subr.bf16.mxu1 %v1674_v0  ;;  %v486_v13 = vld [vmem:[#allocation13] sm:$0xff]  ;;  %s1557_s23 = sshll.u32 %s1678_s24, 4  ;;  %s1558_s23 = int_to_ptr.vmem [resolvable:$false] %s1557_s23 }
  0xf4   : > { %1193 = vmatprep.subr.bf16.mxu0 %v1674_v0  ;;  %p1555_p11 = pnand %p1554_p9, %p2247_p13  ;;  %s1559_s5 = scalar_lea.vmem %s1558_s23, 512 }
  0xf5   : > { %1190 = vmatmul.mubr.msk.bf16.vlgmr.msra.gmra.mrb[0].mxu1 %vm492_vm1, %v465_v15  ;;  %v490_v15 = vpack.c.bf16 %v487_v14, %v486_v13  ;;  %p1560_p6 = scmp.lt.s32.totalorder %s2102_s25, %s1558_s23  ;;  %p1561_p5 = scmp.lt.s32.totalorder %s1559_s5, %s1553_s10 }
  0xf6   : > { %1182 = vmatmul.mubr.msk.bf16.vlgmr.msra.gmra.mrb[0].mxu0 %vm492_vm1, %v463_v16  ;;  %1203 = vmatprep.mubr.msk.bf16.mxu1 %vm1675_vm0, %v1674_v0  ;;  %s2100_s30 = scalar_lea.hbm %s2246_s26, %s1156_s1  ;;  %p1556_p1 = pneg %p1555_p11 }
  0xf7   : > { %1197 = vmatprep.mubr.msk.bf16.mxu0 %vm1675_vm0, %v1674_v0  ;;  %1194 = vmatpush3.bf16.msra.mxu0 %v484_v32  ;;  %p1562_p2 = por %p1561_p5, %p1560_p6 }
  0xf8   : > { %1195 = vmatprep.subr.bf16.mxu0 %v1674_v0 }
  0xf9   : > { %p1563_p4 = pnand %p1562_p2, %p1556_p1 }
  0xfb   : > { %1196 = vmatpush3.bf16.msra.mxu0 %v485_v34 }
  0xfc   : > { %1207 = vmatprep.subr.bf16.mxu0 %v1674_v0 }
  0xfe   : > { %1198 = vmatmul.mubr.msk.bf16.vlgmr.msra.gmra.mrb[4].mxu0 %vm492_vm1, %v467_v36 }
  0xff   : > { %1209 = vmatprep.mubr.msk.bf16.mxu0 %vm1675_vm0, %v1674_v0 }
 0x1c8   : > { %v573_v17 = vpop.f32.mrb[0].mxu1 }
 0x1c9   : > { %v624_v18 = vpack.c.bf16 %v573_v17, %v573_v17  ;;  %v1191_v19 = vpop.f32.mrb[1].mxu1  ;;  %v530_v20 = vpop.f32.mrb[0].mxu0 }
 0x1ca   : > { %v576_v21 = vpop.f32.mrb[2].mxu1  ;;  %v622_v22 = vmul.f32 0.25, %v530_v20  ;;  %v1183_v23 = vpop.f32.mrb[1].mxu0  ;;  %v488_v20 = vld [vmem:[#allocation13 + $0x10] sm:$0xff] }
 0x1cb   : > { %v630_v24 = vsel %vm625_vm2, %v624_v18, 0  ;;  %738 = vrot.lane.b32.xlu0 %v624_v18, %s1676_s20  ;;  %v1192_v25 = vpop.f32.mrb[3].mxu1  ;;  %v533_v26 = vpop.f32.mrb[2].mxu0  ;;  %v489_v21 = vld [vmem:[#allocation13 + $0x18] sm:$0xff] }
 0x1cc   : > { %v623_v27 = vpack.c.bf16 %v622_v22, %v622_v22  ;;  %1202 = vmatpush3.bf16.xpose.msra.mxu1 %v630_v24  ;;  %v1184_v28 = vpop.f32.mrb[3].mxu0  ;;  %v491_v22 = vpack.c.bf16 %v489_v21, %v488_v20 }
 0x1cd   : > { %1213 = vmatprep.subr.bf16.mxu1 %v1674_v0 }
 0x1cf   : > { %735 = vrot.lane.b32.xlu0 %v623_v27, %s1676_s20 }
 0x1d1   : > { %v616_v55 = vpop.f32.mrb[4].mxu0 }
 0x1d2   : > { %v1199_v56 = vpop.f32.mrb[5].mxu0  ;;  %v686_v59 = vpack.c.bf16 %v616_v55, %v616_v55 }
 0x1d3   : > { %1204 = vmatmul.mubr.msk.bf16.vlgmr.msra.gmra.mrb[4].mxu1 %vm625_vm2, %v623_v27  ;;  %v619_v57 = vpop.f32.mrb[6].mxu0 }
 0x1d4   : > { %1215 = vmatprep.mubr.msk.bf16.mxu1 %vm1675_vm0, %v1674_v0  ;;  %v1200_v58 = vpop.f32.mrb[7].mxu0  ;;  %v692_v60 = vsel %vm690_vm4, %v686_v59, 0 }
 0x1d5   : > { %1208 = vmatpush3.bf16.msra.mxu0 %v692_v60 }
 0x1d6   : > { %1219 = vmatprep.subr.bf16.mxu0 %v1674_v0 }
 0x23d   : > { %v739_v37 = vpop.permute.xlu0 %738 }
 0x23e   : > { %v744_v38 = vsel %vm625_vm2, %v739_v37, 0 }
 0x23f   : > { %1214 = vmatpush3.bf16.xpose.msra.mxu1 %v744_v38 }
 0x240   : > { %1225 = vmatprep.subr.bf16.mxu1 %v1674_v0 }
 0x241   : > { %v736_v39 = vpop.permute.xlu0 %735 }
 0x246   : > { %1216 = vmatmul.mubr.msk.bf16.vlgmr.msra.gmra.mrb[8].mxu1 %vm625_vm2, %v736_v39 }
 0x247   : > { %1229 = vmatprep.mubr.msk.bf16.mxu1 %vm1675_vm0, %v1674_v0  ;;  %1226 = vmatpush3.bf16.msra.mxu1 %v490_v15 }
 0x248   : > { %1227 = vmatprep.subr.bf16.mxu1 %v1674_v0 }
 0x24b   : > { %1228 = vmatpush3.bf16.msra.mxu1 %v491_v22 }
 0x2a6   : > { %v666_v40 = vpop.f32.mrb[4].mxu1 }
 0x2a7   : > { %v1205_v41 = vpop.f32.mrb[5].mxu1  ;;  %v673_v42 = vsel %vm672_vm3, %v666_v40, -inf }
 0x2a8   : > { %674 = vmax.xlane.f32.xlu1 %v673_v42  ;;  %v669_v43 = vpop.f32.mrb[6].mxu1 }
 0x2a9   : > { %v1206_v44 = vpop.f32.mrb[7].mxu1 }
 0x319   : > { %v780_v45 = vpop.f32.mrb[8].mxu1 }
 0x31a   : > { %v1217_v46 = vpop.f32.mrb[9].mxu1  ;;  %v786_v47 = vsel %vm672_vm3, %v780_v45, -inf }
 0x31b   : > { %787 = vmax.xlane.f32.xlu1 %v786_v47  ;;  %v783_v48 = vpop.f32.mrb[10].mxu1 }
 0x31c   : > { %v1218_v49 = vpop.f32.mrb[11].mxu1 }
 0x335   : > { %v675_v50 = vpop.xlane.xlu1 %674 }
 0x336   : > { %v676_v51 = vsub.f32 %v666_v40, %v675_v50 }
 0x338   : > { %v677_v52 = vmul.f32 1.442695, %v676_v51 }
 0x33a   : > { %1343 = vpow2.f32 %v677_v52 }
 0x344   : > { %v1344_v53 = vpop.eup %1343 }
 0x345   : > { %v679_v54 = vsel %vm672_vm3, %v1344_v53, 0.0 }
 0x346   : > { %680 = vadd.xlane.f32.xlu0 %v679_v54 }
 0x3a8   : > { %v788_v61 = vpop.xlane.xlu1 %787 }
 0x3a9   : > { %v789_v62 = vsub.f32 %v780_v45, %v788_v61 }
 0x3ab   : > { %v790_v63 = vmul.f32 1.442695, %v789_v62 }
 0x3ad   : > { %1345 = vpow2.f32 %v790_v63 }
 0x3b7   : > { %v1346_v1 = vpop.eup %1345 }
 0x3b8   : > { %v792_v2 = vsel %vm672_vm3, %v1346_v1, 0.0 }
 0x3b9   : > { %793 = vadd.xlane.f32.xlu1 %v792_v2 }
 0x3ca   : > { %801 = vrot.lane.b32.xlu1 %v686_v59, %s1676_s20 }
 0x3d3   : > { %v681_v3 = vpop.xlane.xlu0 %680 }
 0x3d4   : > { %1347 = vrcp.f32 %v681_v3 }
 0x3de   : > { %v1348_v4 = vpop.eup %1347 }
 0x3df   : > { %v683_v5 = vmul.f32 %v1348_v4, %v1344_v53 }
 0x3e1   : > { %v685_v6 = vpack.c.bf16 %v683_v5, %v683_v5  ;;  %684 = vst.msk [vmem:[%s2081_s16] sm:$0xff] %vm672_vm3, %v683_v5 }
 0x3e3   : > { %1210 = vmatmul.mubr.msk.bf16.vlgmr.msra.gmra.mrb[8].mxu0 %vm672_vm3, %v685_v6 }
 0x3e4   : > { %1221 = vmatprep.mubr.msk.bf16.mxu0 %vm1675_vm0, %v1674_v0 }
 0x446   : > { %v794_v7 = vpop.xlane.xlu1 %793 }
 0x447   : > { %1349 = vrcp.f32 %v794_v7 }
 0x44a   : > { %v802_v8 = vpop.permute.xlu1 %801 }
 0x44b   : > { %v807_v9 = vsel %vm690_vm4, %v802_v8, 0 }
 0x44c   : > { %1220 = vmatpush3.bf16.msra.mxu0 %v807_v9 }
 0x451   : > { %v1350_v10 = vpop.eup %1349 }
 0x452   : > { %v796_v11 = vmul.f32 %v1350_v10, %v1346_v1 }
 0x454   : > { %v799_v12 = vpack.c.bf16 %v796_v11, %v796_v11  ;;  %1146 = vst.msk [vmem:[%s2081_s16 + $0x8] sm:$0xff] %vm672_vm3, %v796_v11 }
 0x456   : > { %1222 = vmatmul.mubr.msk.bf16.vlgmr.msra.gmra.mrb[12].mxu0 %vm672_vm3, %v799_v12 }
 0x4b6   : > { %v728_v16 = vpop.f32.mrb[8].mxu0 }
 0x4b7   : > { %v1211_v17 = vpop.f32.mrb[9].mxu0 }
 0x4b8   : > { %v731_v18 = vpop.f32.mrb[10].mxu0 }
 0x4b9   : > { %v1212_v19 = vpop.f32.mrb[11].mxu0 }
 0x529   : > { %v843_v23 = vpop.f32.mrb[12].mxu0 }
 0x52a   : > { %850 = vrot.lane.b32.xlu1 %v843_v23, %s1677_s13  ;;  %v1223_v24 = vpop.f32.mrb[13].mxu0 }
 0x52b   : > { %v846_v25 = vpop.f32.mrb[14].mxu0 }
 0x52c   : > { %v1224_v26 = vpop.f32.mrb[15].mxu0 }
 0x59c   : > { %v851_v27 = vpop.permute.xlu1 %850 }
 0x59d   : > { %v853_v0 = vsel %vm625_vm2, %v728_v16, %v851_v27 }
 0x59e   : > { %v854_v28 = vpack.c.bf16 %v853_v0, %v853_v0 }
 0x5a0   : > { %1230 = vmatmul.mubr.msk.bf16.vlgmr.msra.gmra.mrb[12].mxu1 %vm492_vm1, %v854_v28 }
 0x5a1   : > { %1566 = shalt.err (!%p1563_p4)
}
 0x5a2   : > { %s1567_s8 = scalar_lea.hbm %s2100_s30, 256  ;;  %s1571_s19 = scalar_lea.hbm %s2246_s26, 512 }
 0x5a3   : > { %p1568_p10 = scmp.ne.s32.totalorder %s2100_s30, %s1567_s8  ;;  %p1572_p12 = scmp.lt.u32.totalorder %s2100_s30, %s2246_s26 }
 0x5a4   : > { %p1573_p0 = scmp.lt.u32.totalorder %s1571_s19, %s1567_s8  ;;  %p1575_p9 = scmp.lt.u32.totalorder %s1567_s8, %s2100_s30 }
 0x5a5   : > { %p1569_p3 = pnand %p1568_p10, %p2247_p13 }
 0x5a6   : > { %p1574_p7 = por %p1573_p0, %p1572_p12 }
 0x5a7   : > { %p1570_p8 = pneg %p1569_p3 }
 0x5a8   : > { %p1576_p11 = por %p1575_p9, %p1574_p7 }
 0x5aa   : > { %p1577_p1 = pnand %p1576_p11, %p1570_p8 }
 0x5ac   : > { %1580 = shalt.err (!%p1577_p1)
}
 0x5ad   : > { %s1679_s20 = smov 128   ;;  %s1680_s15 = smov 8  }
 0x5ae   : > { %1256 = dma.vmem_to_hbm [thread:$0]  (%p2247_p13), %s2102_s25, 256, %s2100_s30, %s905_s18, %s1679_s20, %s1679_s20, %s1680_s15  }
 0x5af   : > { %s1151_s16 = sshll.u32 %s1748_s11, 7  ;;  %s453_s13 = scalar_lea.vmem [#allocation14], %s2013_s7 }
 0x5b0   : > { %s918_s1 = sshll.u32 %s453_s13, 4  ;;  %s2248_s10 = sld [smem:[#allocation31_spill]]  ;;  %s2135_s1 = int_to_ptr.vmem [resolvable:$true] %s918_s1 }
 0x5b1   : > { %s900_s23 = scalar_lea.sflag [#allocation4], %s2010_s17  ;;  %s1581_s25 = scalar_lea.vmem %s2135_s1, 128 }
 0x5b2   : > { %p1582_p6 = scmp.ne.s32.totalorder %s2135_s1, %s1581_s25  ;;  %s1681_s11 = smov [#allocation14]  }
 0x5b3   : > { %s1585_s7 = sshll.u32 %s1681_s11, 4  ;;  %s1586_s7 = int_to_ptr.vmem [resolvable:$false] %s1585_s7 }
 0x5b4   : > { %p1583_p5 = pnand %p1582_p6, %p2247_p13  ;;  %s1587_s30 = scalar_lea.vmem %s1586_s7, 256 }
 0x5b5   : > { %p1588_p4 = scmp.lt.s32.totalorder %s2135_s1, %s1586_s7  ;;  %p1589_p10 = scmp.lt.s32.totalorder %s1587_s30, %s1581_s25 }
 0x5b6   : > { %s2133_s24 = scalar_lea.hbm %s2248_s10, %s1151_s16  ;;  %p1584_p2 = pneg %p1583_p5 }
 0x5b7   : > { %p1590_p3 = por %p1589_p10, %p1588_p4 }
 0x5b9   : > { %p1591_p8 = pnand %p1590_p3, %p1584_p2 }
 0x673   : > { %v892_v29 = vpop.f32.mrb[12].mxu1 }
 0x674   : > { %898 = vst.msk [vmem:[%s453_s13] sm:$0xff] %vm492_vm1, %v892_v29  ;;  %v1231_v30 = vpop.f32.mrb[13].mxu1 }
 0x675   : > { %v895_v31 = vpop.f32.mrb[14].mxu1 }
 0x676   : > { %1594 = shalt.err (!%p1591_p8)
}
 0x677   : > { %s1595_s17 = scalar_lea.hbm %s2133_s24, 128  ;;  %s1599_s8 = scalar_lea.hbm %s2248_s10, 256 }
 0x678   : > { %p1596_p12 = scmp.ne.s32.totalorder %s2133_s24, %s1595_s17  ;;  %p1600_p9 = scmp.lt.u32.totalorder %s2133_s24, %s2248_s10 }
 0x679   : > { %p1601_p11 = scmp.lt.u32.totalorder %s1599_s8, %s1595_s17  ;;  %p1603_p6 = scmp.lt.u32.totalorder %s1595_s17, %s2133_s24 }
 0x67a   : > { %p1597_p0 = pnand %p1596_p12, %p2247_p13 }
 0x67b   : > { %p1602_p1 = por %p1601_p11, %p1600_p9 }
 0x67c   : > { %p1598_p7 = pneg %p1597_p0 }
 0x67d   : > { %p1604_p5 = por %p1603_p6, %p1602_p1 }
 0x67f   : > { %p1605_p2 = pnand %p1604_p5, %p1598_p7 }
 0x681   : > { %1608 = shalt.err (!%p1605_p2)
}
 0x682   : > { %1255 = dma.vmem_to_hbm [thread:$0]  (%p2247_p13), %s2135_s1, 128, %s2133_s24, %s900_s23   ;;  %v1232_v32 = vpop.f32.mrb[15].mxu1 }
 0x683 PF: > { %s2249_s19 = sld [smem:[#allocation23_spill]]  ;;  %s2250_s9 = sld [smem:[#allocation27_spill]] }
 0x684   : > { %s2251_s21 = sld [smem:[#allocation24_spill]] }
 0x689   : > { %s946_s20 = sand.u32 1, %s2249_s19   ;;  %p2252_p4 = scmp.ne.s32.totalorder %s2250_s9, 0 }
 0x68a   : > { %p2253_p10 = scmp.ge.s32.totalorder %s2251_s21, 2  ;;  %s947_s15 = scalar_lea.sflag [#allocation4], %s946_s20 }
 0x68c   : > { %p1283_p3 = pnand %p2253_p10, %p2252_p4 }
 0x68e   : > { %1642 = dma.done.wait (!%p1283_p3), %s947_s15, 128  }
 0x68f   : > { %1644 = vsyncadd (!%p1283_p3), %s947_s15, 4294967168  ;;  %s956_s16 = scalar_lea.sflag [#allocation16], %s946_s20 }
 0x690   : > { %1646 = dma.done.wait (!%p1283_p3), %s956_s16, 256  }
 0x691   : > { %1648 = vsyncadd (!%p1283_p3), %s956_s16, 4294967040  ;;  %s2254_s30 = sld [smem:[#allocation25_spill]]  ;;  %s2255_s22 = sld [smem:[#allocation26_spill]] }
 0x692   : > { %s2256_s27 = smov %s1655_s28  ;;  %s2257_s28 = smov %s1659_s29 }
 0x697   : > { %p30_p13 = scmp.ge.s32.totalorder %s2254_s30, 4   ;;  %s2258_s29 = smov %s2255_s22 }
 0x699   :  { %32 = sbr.rel (!%p30_p13) target bundleno = 17 (0x11), region = 151 }
 0x6a0   :  { %961 = vsyncpa [#allocation3], 1 }
 0x6a1   :  { %963 = vsyncpa [#allocation3 + $0x1], 1 }
 0x6a2   :  { %964 = vsyncpa [#allocation6], 1 }
 0x6a3   :  { %966 = vsyncpa [#allocation6 + $0x1], 1 }
 0x6a4   :  { %967 = vsyncpa [#allocation9], 1 }
 0x6a5   :  { %968 = vsyncpa [#allocation12], 1 }
 0x6a6   :  { %969 = vsyncpa [#allocation4], 1 }
 0x6a7   :  { %971 = vsyncpa [#allocation4 + $0x1], 1 }
 0x6a8   :  { %972 = vsyncpa [#allocation16], 1 }
 0x6a9   :  { %974 = vsyncpa [#allocation16 + $0x1], 1 }

</bundles_post_ra>
